<compile_context>
chip_gen: v7x
topology: tpu7x:2x2x1
jax: 0.10.0
libtpu: 0.0.40
codegen_flags: <defaults>
</compile_context>

<pallas_src>
import functools

import jax
import jax.numpy as jnp
from jax.experimental import pallas as pl
from jax.experimental.pallas import tpu as pltpu


def _deepshuffle1d_kernel(gama_ref, x_ref, w_ref, o_ref, *, exact):
    # gama_ref: (1,) f32 in SMEM
    # x_ref:    (tb, Cin, L)    w_ref: (TCout, Cin)    o_ref: (tb, TCout, L)
    gama = gama_ref[0]
    w = w_ref[...]
    tb = x_ref.shape[0]
    length = x_ref.shape[-1]

    # Unbiased variance divides by (L - 1); L == 1 intentionally yields NaN, matching
    # torch.var(unbiased=True).  Not a kernel bug.
    inv_nm1 = jnp.float32(1.0 / (length - 1)) if length > 1 else jnp.float32(float("nan"))
    eps = jnp.float32(1e-9)

    def body(bb, carry):
        xb = x_ref[bb]                                                   # (Cin, L)
        # Conv1d(k=1) == channel matmul; the conv bias is omitted on purpose: it cancels
        # exactly in (y - mean) and does not change var.
        y = jnp.dot(w, xb, preferred_element_type=jnp.float32)           # (TCout, L) f32
        mean = jnp.mean(y, axis=1, keepdims=True)                        # (TCout, 1)
        diff = y - mean
        var = jnp.sum(diff * diff, axis=1, keepdims=True) * inv_nm1      # (TCout, 1)
        # Fold gama and the variance reciprocal into one per-channel scale column:
        # TCout divides per batch element instead of TCout*L per-element divides.
        if exact:
            scale = gama / (var + eps)
        else:
            scale = gama * pl.reciprocal(var + eps, approx=True)         # EUP slot, ~free
        o_ref[bb] = (diff * scale).astype(o_ref.dtype)
        return carry

    if tb <= 8:
        # Small packed batch: plain unrolled loop with static indices.
        for bb in range(tb):
            body(bb, None)
    else:
        # Large packed batch: fori_loop bounds vreg live ranges (static Python loops do
        # not), avoiding spills that would contend with the DMA double buffers for VMEM.
        jax.lax.fori_loop(0, tb, body, None)


def _device_kind():
    try:
        return jax.devices()[0].device_kind.lower()
    except Exception:
        return ""


def _vmem_capacity_bytes():
    try:
        return int(pltpu.get_tpu_info().vmem_capacity_bytes)
    except Exception:
        pass
    kind = _device_kind()
    if "v7" in kind or "7x" in kind:
        return 64 * 1024 * 1024
    return 128 * 1024 * 1024


def deepshuffle1d(x, weight, bias=None, gama=1.0, *, matmul_dtype=None,
                  out_dtype=jnp.float32, exact=True):
    """DeepShuffle1d forward.

    x: (B, Cin, L); weight: (Cout, Cin) (Conv1d k=1 weight squeezed); bias: (Cout,) or None.
    Returns (B, Cout, L) in `out_dtype`.

    bias is accepted for API parity with the PyTorch module but is NOT used: the operator
    gama*(y-mean)/(var+eps) is mathematically invariant to a per-channel constant.

    matmul_dtype: optionally cast x / weight (e.g. jnp.bfloat16) before the kernel.  Valid
    on all generations (v5e/v6e/v7x MXUs take bf16 with f32 accumulation; the elementwise
    normalization stays f32).  Halves HBM read traffic.  Default None keeps f32 parity.
    out_dtype: e.g. jnp.bfloat16 to halve the dominant output-write HBM traffic.
    exact: False uses the EUP approximate reciprocal (~2^-12 error) for the scale.
    """
    del bias  # mathematically a no-op for this operator (cancels in y - mean)

    B, Cin, L = x.shape
    Cout = weight.shape[0]

    if matmul_dtype is not None:
        x = x.astype(matmul_dtype)
        weight = weight.astype(matmul_dtype)

    # SMEM scalar input: changing gama does not trigger a recompile.
    gama_arr = jnp.asarray([gama], dtype=jnp.float32)

    in_bytes = jnp.dtype(x.dtype).itemsize
    out_bytes = jnp.dtype(out_dtype).itemsize

    # ---- generation-aware budgets -------------------------------------------
    kind = _device_kind()
    is_v5e = ("v5e" in kind) or ("v5 lite" in kind) or ("v5lite" in kind)
    is_v7 = ("v7" in kind) or ("7x" in kind)
    vmem_cap = _vmem_capacity_bytes()
    small_vmem = is_v7 or vmem_cap <= 80 * 1024 * 1024          # v7x-class: 64 MiB / TC
    ws_budget = (26 if small_vmem else 44) * 1024 * 1024        # double-buffered working set
    vmem_limit_cap = (48 if small_vmem else 96) * 1024 * 1024

    # ---- Cout tile -----------------------------------------------------------
    # v5e MXU is 4x128x128 -> prefer 128-row output tiles; v6e/v7x (2x256x256) -> prefer 256.
    tcout = Cout
    for cand in ((128,) if is_v5e else (256, 128)):
        if Cout % cand == 0:
            tcout = cand
            break

    def _ws_terms(tc):
        fixed = 2 * tc * Cin * in_bytes                          # double-buffered weight tile
        per_b = 2 * L * (Cin * in_bytes + tc * out_bytes)        # double-buffered x + out / batch
        return fixed, per_b

    fixed, per_b = _ws_terms(tcout)
    if fixed + per_b > ws_budget and tcout > 128 and Cout % 128 == 0:
        tcout = 128
        fixed, per_b = _ws_terms(tcout)

    # ---- batch packing (amortizes ~0.35us per grid step) ---------------------
    tb_budget = max(1, (ws_budget - fixed) // per_b) if ws_budget > fixed else 1
    tb_cap = max(1, min(B, 32, tb_budget))
    tb = 1
    for d in range(tb_cap, 0, -1):
        if B % d == 0:
            tb = d
            break

    # ---- v7x: make sure both TensorCores get work ----------------------------
    if is_v7 and (B // tb) * (Cout // tcout) < 2:
        if tb > 1:
            for d in range(tb - 1, 0, -1):
                if B % d == 0:
                    tb = d
                    break
        elif tcout % 2 == 0 and (tcout // 2) % 8 == 0:
            tcout = tcout // 2

    nb, nc = B // tb, Cout // tcout

    # ---- grid order: minimize redundant HBM re-fetch -------------------------
    # batch-outer re-reads the weight (nb-1) extra times; cout-outer re-reads x (nc-1) times.
    redundant_w = (nb - 1) * Cout * Cin * in_bytes
    redundant_x = (nc - 1) * B * Cin * L * in_bytes
    cout_outer = redundant_x < redundant_w

    if cout_outer:
        grid = (nc, nb)
        x_map = lambda c, b: (b, 0, 0)
        w_map = lambda c, b: (c, 0)
        o_map = lambda c, b: (b, c, 0)
    else:
        grid = (nb, nc)
        x_map = lambda b, c: (b, 0, 0)
        w_map = lambda b, c: (c, 0)
        o_map = lambda b, c: (b, c, 0)

    # ---- VMEM limit with explicit footprint accounting ------------------------
    footprint = 2 * (tcout * Cin * in_bytes
                     + tb * Cin * L * in_bytes
                     + tb * tcout * L * out_bytes)
    vmem_limit = int(max(min(footprint + (8 << 20), vmem_limit_cap), 32 << 20))
    if footprint + (4 << 20) > vmem_limit:
        # Oversized block (no L/Cin tiling yet): best-effort raise toward physical VMEM.
        vmem_limit = int(min(footprint + (8 << 20), max(vmem_cap - (4 << 20), 32 << 20)))

    cost = pl.CostEstimate(
        flops=2 * B * Cout * Cin * L + 6 * B * Cout * L,
        transcendentals=0,
        bytes_accessed=(B * Cin * L * in_bytes + Cout * Cin * in_bytes
                        + B * Cout * L * out_bytes),
    )

    kernel = functools.partial(_deepshuffle1d_kernel, exact=exact)

    return pl.pallas_call(
        kernel,
        out_shape=jax.ShapeDtypeStruct((B, Cout, L), out_dtype),
        grid_spec=pltpu.PrefetchScalarGridSpec(
            num_scalar_prefetch=0,
            grid=grid,
            in_specs=[
                # gama lives in SMEM (scalar parameter, untiled).
                pl.BlockSpec(memory_space=pltpu.MemorySpace.SMEM),
                # x: tb batches per step; Cin/L untiled (the reduction is over L).
                pl.BlockSpec((tb, Cin, L), x_map),
                # weight: tiled over Cout only; constant across the inner grid axis so it
                # is not re-fetched per inner step.
                pl.BlockSpec((tcout, Cin), w_map),
            ],
            out_specs=pl.BlockSpec((tb, tcout, L), o_map),
        ),
        compiler_params=pltpu.CompilerParams(
            # Batch and Cout tiles are fully independent -> both megacore-shardable.
            dimension_semantics=("parallel", "parallel"),
            vmem_limit_bytes=vmem_limit,
        ),
        cost_estimate=cost,
    )(gama_arr, x, weight)


def _reference(x, weight, bias, gama):
    # Pointwise conv computed with broadcast-multiply + sum (pure f32 VPU math) so the
    # parity check does not depend on XLA's default matmul precision on TPU.
    y = jnp.sum(x[:, None, :, :] * weight[None, :, :, None], axis=2) + bias[None, :, None]
    mean = jnp.mean(y, axis=2, keepdims=True)
    var = jnp.sum((y - mean) ** 2, axis=2, keepdims=True) / (y.shape[2] - 1)
    return gama * (y - mean) / (var + 1e-9)


if __name__ == "__main__":
    key = jax.random.PRNGKey(0)
    kx, kw, kb = jax.random.split(key, 3)

    B, Cin, Cout, L = 2, 4, 8, 16
    gama = 0.5

    x = jax.random.normal(kx, (B, Cin, L), dtype=jnp.float32)
    # Conv1d weight (Cout, Cin, 1) squeezed to (Cout, Cin); bias (Cout,).
    weight = jax.random.normal(kw, (Cout, Cin), dtype=jnp.float32) * 0.1
    bias = jax.random.normal(kb, (Cout,), dtype=jnp.float32) * 0.1

    out = deepshuffle1d(x, weight, bias, gama)
    out = jax.block_until_ready(out)

    ref = _reference(x, weight, bias, gama)
    assert out.shape == (B, Cout, L)
    assert jnp.allclose(out, ref, atol=1e-4, rtol=1e-4), "mismatch vs reference"

    print("KERNEL_OK")
</pallas_src>

<mosaic_0001>
module attributes {stable_mosaic.version = 11 : i64} {
  func.func @_deepshuffle1d_kernel(%arg0: i32, %arg1: i32, %arg2: memref<1xf32, #tpu.memory_space<smem>>, %arg3: memref<2x4x16xf32, #tpu.memory_space<vmem>>, %arg4: memref<8x4xf32, #tpu.memory_space<vmem>>, %arg5: memref<2x8x16xf32, #tpu.memory_space<vmem>>) attributes {dimension_semantics = [#tpu.dimension_semantics<parallel>, #tpu.dimension_semantics<parallel>], iteration_bounds = array<i64: 1, 1>, scalar_prefetch = 0 : i64, scratch_operands = 0 : i64, tpu.core_type = #tpu.core_type<tc>, window_params = [{transform_indices = @transform_0, window_bounds = array<i64: 1>}, {transform_indices = @transform_1, window_bounds = array<i64: 2, 4, 16>}, {transform_indices = @transform_2, window_bounds = array<i64: 8, 4>}, {transform_indices = @transform_3, window_bounds = array<i64: 2, 8, 16>}]} {
    %c0 = arith.constant 0 : index
    %0 = memref.load %arg2[%c0] : memref<1xf32, #tpu.memory_space<smem>>
    %c0_0 = arith.constant 0 : index
    %c0_1 = arith.constant 0 : index
    %1 = vector.load %arg4[%c0_0, %c0_1] : memref<8x4xf32, #tpu.memory_space<vmem>>, vector<8x4xf32>
    %c0_2 = arith.constant 0 : index
    %c0_3 = arith.constant 0 : index
    %c0_4 = arith.constant 0 : index
    %2 = vector.load %arg3[%c0_2, %c0_3, %c0_4] : memref<2x4x16xf32, #tpu.memory_space<vmem>>, vector<1x4x16xf32>
    %3 = vector.shape_cast %2 : vector<1x4x16xf32> to vector<4x16xf32>
    %cst = arith.constant dense<0.000000e+00> : vector<8x16xf32>
    %4 = tpu.matmul %1, %3, %cst {dimension_numbers = #tpu.dot_dimension_numbers<[1], [0], [0], [1], [0, 0, 1, 1], [], []>} : vector<8x4xf32>, vector<4x16xf32>, vector<8x16xf32> -> vector<8x16xf32>
    %cst_5 = arith.constant dense<0.000000e+00> : vector<8xf32>
    %5 = vector.multi_reduction <add>, %4, %cst_5 [1] : vector<8x16xf32> to vector<8xf32>
    %6 = vector.shape_cast %5 : vector<8xf32> to vector<8x1xf32>
    %cst_6 = arith.constant 1.600000e+01 : f32
    %7 = vector.broadcast %cst_6 : f32 to vector<8x1xf32>
    %8 = arith.divf %6, %7 : vector<8x1xf32>
    %9 = vector.broadcast %8 : vector<8x1xf32> to vector<8x16xf32>
    %10 = arith.subf %4, %9 : vector<8x16xf32>
    %11 = arith.mulf %10, %10 : vector<8x16xf32>
    %cst_7 = arith.constant dense<0.000000e+00> : vector<8xf32>
    %12 = vector.multi_reduction <add>, %11, %cst_7 [1] : vector<8x16xf32> to vector<8xf32>
    %13 = vector.shape_cast %12 : vector<8xf32> to vector<8x1xf32>
    %cst_8 = arith.constant 0.0666666701 : f32
    %14 = vector.broadcast %cst_8 : f32 to vector<8x1xf32>
    %15 = arith.mulf %13, %14 : vector<8x1xf32>
    %cst_9 = arith.constant 9.99999971E-10 : f32
    %16 = vector.broadcast %cst_9 : f32 to vector<8x1xf32>
    %17 = arith.addf %15, %16 : vector<8x1xf32>
    %18 = vector.broadcast %0 : f32 to vector<8x1xf32>
    %19 = arith.divf %18, %17 : vector<8x1xf32>
    %20 = vector.broadcast %19 : vector<8x1xf32> to vector<8x16xf32>
    %21 = arith.mulf %10, %20 : vector<8x16xf32>
    %c0_10 = arith.constant 0 : index
    %c0_11 = arith.constant 0 : index
    %c0_12 = arith.constant 0 : index
    %22 = vector.load %arg5[%c0_10, %c0_11, %c0_12] : memref<2x8x16xf32, #tpu.memory_space<vmem>>, vector<1x8x16xf32>
    %23 = vector.shape_cast %22 : vector<1x8x16xf32> to vector<8x16xf32>
    %24 = vector.shape_cast %21 : vector<8x16xf32> to vector<1x8x16xf32>
    tpu.vector_store %arg5[%c0_10, %c0_11, %c0_12], %24 {strides = array<i32>} : memref<2x8x16xf32, #tpu.memory_space<vmem>>, vector<1x8x16xf32>,
    %c1 = arith.constant 1 : index
    %c0_13 = arith.constant 0 : index
    %c0_14 = arith.constant 0 : index
    %25 = vector.load %arg3[%c1, %c0_13, %c0_14] : memref<2x4x16xf32, #tpu.memory_space<vmem>>, vector<1x4x16xf32>
    %26 = vector.shape_cast %25 : vector<1x4x16xf32> to vector<4x16xf32>
    %cst_15 = arith.constant dense<0.000000e+00> : vector<8x16xf32>
    %27 = tpu.matmul %1, %26, %cst_15 {dimension_numbers = #tpu.dot_dimension_numbers<[1], [0], [0], [1], [0, 0, 1, 1], [], []>} : vector<8x4xf32>, vector<4x16xf32>, vector<8x16xf32> -> vector<8x16xf32>
    %cst_16 = arith.constant dense<0.000000e+00> : vector<8xf32>
    %28 = vector.multi_reduction <add>, %27, %cst_16 [1] : vector<8x16xf32> to vector<8xf32>
    %29 = vector.shape_cast %28 : vector<8xf32> to vector<8x1xf32>
    %cst_17 = arith.constant 1.600000e+01 : f32
    %30 = vector.broadcast %cst_17 : f32 to vector<8x1xf32>
    %31 = arith.divf %29, %30 : vector<8x1xf32>
    %32 = vector.broadcast %31 : vector<8x1xf32> to vector<8x16xf32>
    %33 = arith.subf %27, %32 : vector<8x16xf32>
    %34 = arith.mulf %33, %33 : vector<8x16xf32>
    %cst_18 = arith.constant dense<0.000000e+00> : vector<8xf32>
    %35 = vector.multi_reduction <add>, %34, %cst_18 [1] : vector<8x16xf32> to vector<8xf32>
    %36 = vector.shape_cast %35 : vector<8xf32> to vector<8x1xf32>
    %cst_19 = arith.constant 0.0666666701 : f32
    %37 = vector.broadcast %cst_19 : f32 to vector<8x1xf32>
    %38 = arith.mulf %36, %37 : vector<8x1xf32>
    %cst_20 = arith.constant 9.99999971E-10 : f32
    %39 = vector.broadcast %cst_20 : f32 to vector<8x1xf32>
    %40 = arith.addf %38, %39 : vector<8x1xf32>
    %41 = vector.broadcast %0 : f32 to vector<8x1xf32>
    %42 = arith.divf %41, %40 : vector<8x1xf32>
    %43 = vector.broadcast %42 : vector<8x1xf32> to vector<8x16xf32>
    %44 = arith.mulf %33, %43 : vector<8x16xf32>
    %c1_21 = arith.constant 1 : index
    %c0_22 = arith.constant 0 : index
    %c0_23 = arith.constant 0 : index
    %45 = vector.load %arg5[%c1_21, %c0_22, %c0_23] : memref<2x8x16xf32, #tpu.memory_space<vmem>>, vector<1x8x16xf32>
    %46 = vector.shape_cast %45 : vector<1x8x16xf32> to vector<8x16xf32>
    %47 = vector.shape_cast %44 : vector<8x16xf32> to vector<1x8x16xf32>
    tpu.vector_store %arg5[%c1_21, %c0_22, %c0_23], %47 {strides = array<i32>} : memref<2x8x16xf32, #tpu.memory_space<vmem>>, vector<1x8x16xf32>,
    return
  }
  func.func @transform_0(%arg0: i32, %arg1: i32) -> i32 {
    %c0_i32 = arith.constant 0 : i32
    %c0_i32_0 = arith.constant 0 : i32
    return %c0_i32 : i32
  }
  func.func @transform_1(%arg0: i32, %arg1: i32) -> (i32, i32, i32) {
    %c0_i32 = arith.constant 0 : i32
    %c0_i32_0 = arith.constant 0 : i32
    %c0_i32_1 = arith.constant 0 : i32
    return %arg0, %c0_i32, %c0_i32_0 : i32, i32, i32
  }
  func.func @transform_2(%arg0: i32, %arg1: i32) -> (i32, i32) {
    %c0_i32 = arith.constant 0 : i32
    %c0_i32_0 = arith.constant 0 : i32
    return %arg1, %c0_i32 : i32, i32
  }
  func.func @transform_3(%arg0: i32, %arg1: i32) -> (i32, i32, i32) {
    %c0_i32 = arith.constant 0 : i32
    %c0_i32_0 = arith.constant 0 : i32
    return %arg0, %arg1, %c0_i32 : i32, i32, i32
  }
}

</mosaic_0001>

<bundles_post_ra>
// kernel: tpu_custom_call.1
= control target key start
LH: loop header
LB: loop body
LE: loop exit
PB: predicated region body
PF: predicated region fallthrough
CT: control target
= control target key end

     0   :  { %vm23_vm0 = vcmask 1043456   ;;  %v274_v2 = vmov 0.0   ;;  %vm275_vm1 = vmmov 0   ;;  %vm19_vm2 = vcmask 31744   ;;  %s329_s0 = inlined_call_operand.<no memory space> [shape: f32[1], index: 0, kind: input, shape index: {}]   ;;  %s330_s1 = inlined_call_operand.vmem [shape: f32[2,4,16], index: 1, kind: input, shape index: {}]   ;;  %s331_s2 = inlined_call_operand.vmem [shape: f32[8,4], index: 2, kind: input, shape index: {}]   ;;  %s332_s3 = inlined_call_operand.hbm [shape: f32[2,8,16], index: 3, kind: output, shape index: {}]  }
   0x1   :  { %v18_v0 = vld [vmem:[%s330_s1] sm:$0xf]  ;;  %231 = vmatprep.subr.mxu0 %v274_v2  ;;  %233 = vmatprep.mubr.msk.f32.mxu0 %vm275_vm1, %v274_v2  ;;  %v224_v3 = vld [vmem:[%s330_s1 + $0x4] sm:$0xf] }
   0x2   :  { %v17_v1 = vld [vmem:[%s331_s2] sm:$0xff] }
   0x3   :  { %9 = vsyncpa [#allocation4], 0  ;;  %232 = vmatpush3.msk.msra.mxu0 %vm23_vm0, %v18_v0  ;;  %236 = vmatprep.subr.mxu1 %v274_v2  ;;  %vm97_vm3 = vcmask 130048   ;;  %v110_v26 = vstv %s329_s0  ;;  %s276_s18 = smov [#allocation3]  }
   0x4   :  { %234 = vmatmul.mubr.msk.f32.vlgmr.msra.gmra.mrb[0].mxu0 %vm19_vm2, %v17_v1  ;;  %237 = vmatpush3.msk.msra.mxu1 %vm23_vm0, %v224_v3  ;;  %s211_s19 = sshll.u32 %s276_s18, 4  ;;  %s212_s19 = int_to_ptr.vmem [resolvable:$true] %s211_s19 }
   0x5   :  { %238 = vmatprep.mubr.msk.f32.mxu1 %vm275_vm1, %v274_v2  ;;  %s250_s20 = scalar_lea.vmem %s212_s19, 256  ;;  %p255_p1 = scmp.lt.s32.totalorder %s212_s19, %s212_s19 }
   0x6   :  { %239 = vmatmul.mubr.msk.f32.vlgmr.msra.gmra.mrb[0].mxu1 %vm19_vm2, %v17_v1  ;;  %p251_p0 = scmp.ne.s32.totalorder %s212_s19, %s250_s20  ;;  %p256_p2 = scmp.lt.s32.totalorder %s250_s20, %s250_s20 }
   0x8   :  { %p257_p3 = por %p256_p2, %p255_p1 }
   0xa   :  { %p258_p4 = pnand %p257_p3, %p251_p0 }
  0xd7   :  { %v93_v4 = vpop.f32.mrb[0].mxu0 }
  0xd8   :  { %v235_v5 = vpop.f32.mrb[1].mxu0  ;;  %v98_v6 = vsel %vm97_vm3, %v93_v4, 0.0 }
  0xd9   :  { %99 = vadd.xlane.f32.xlu0 %v98_v6  ;;  %v186_v7 = vpop.f32.mrb[0].mxu1 }
  0xda   :  { %v240_v8 = vpop.f32.mrb[1].mxu1  ;;  %v190_v9 = vsel %vm97_vm3, %v186_v7, 0.0 }
  0xdd   :  { %191 = vadd.xlane.f32.xlu0 %v190_v9 }
 0x166   :  { %v100_v10 = vpop.xlane.xlu0 %99 }
 0x167   :  { %v102_v11 = vmul.f32 0.0625, %v100_v10 }
 0x169   :  { %v103_v12 = vsub.f32 %v93_v4, %v102_v11 }
 0x16a   :  { %v192_v13 = vpop.xlane.xlu0 %191 }
 0x16b   :  { %v193_v14 = vmul.f32 0.0625, %v192_v13  ;;  %v104_v15 = vmul.f32 %v103_v12, %v103_v12 }
 0x16d   :  { %v194_v16 = vsub.f32 %v186_v7, %v193_v14  ;;  %v105_v17 = vsel %vm97_vm3, %v104_v15, 0.0 }
 0x16e   :  { %106 = vadd.xlane.f32.xlu1 %v105_v17 }
 0x16f   :  { %v195_v18 = vmul.f32 %v194_v16, %v194_v16 }
 0x171   :  { %v196_v19 = vsel %vm97_vm3, %v195_v18, 0.0 }
 0x172   :  { %197 = vadd.xlane.f32.xlu1 %v196_v19 }
 0x1fb   :  { %v107_v20 = vpop.xlane.xlu1 %106 }
 0x1fc   :  { %v108_v21 = vmul.f32 0.06666667, %v107_v20 }
 0x1fe   :  { %v109_v22 = vadd.f32 1e-09, %v108_v21 }
 0x1ff   :  { %v198_v23 = vpop.xlane.xlu1 %197 }
 0x200   :  { %246 = vrcp.f32 %v109_v22  ;;  %v199_v24 = vmul.f32 0.06666667, %v198_v23 }
 0x202   :  { %v200_v25 = vadd.f32 1e-09, %v199_v24 }
 0x204   :  { %248 = vrcp.f32 %v200_v25 }
 0x20a   :  { %v247_v27 = vpop.eup %246 }
 0x20b   :  { %v112_v28 = vmul.f32 %v247_v27, %v110_v26 }
 0x20d   :  { %v113_v29 = vmul.f32 %v112_v28, %v103_v12 }
 0x20e   :  { %v249_v30 = vpop.eup %248 }
 0x20f   :  { %v202_v31 = vmul.f32 %v249_v30, %v110_v26  ;;  %114 = vst.msk [vmem:[#allocation3] sm:$0xff] %vm97_vm3, %v113_v29 }
 0x211   :  { %v203_v32 = vmul.f32 %v202_v31, %v194_v16 }
 0x213   :  { %205 = vst.msk [vmem:[#allocation3 + $0x8] sm:$0xff] %vm97_vm3, %v203_v32 }
 0x214   :  { %261 = shalt.err (!%p258_p4)
}
 0x215   :  { %s262_s22 = scalar_lea.hbm %s332_s3, 256 }
 0x216   :  { %p263_p5 = scmp.ne.s32.totalorder %s332_s3, %s262_s22  ;;  %p266_p6 = scmp.lt.u32.totalorder %s262_s22, %s332_s3 }
 0x218   :  { %p268_p7 = pnand %p266_p6, %p263_p5 }
 0x21a   :  { %271 = shalt.err (!%p268_p7)
}
 0x21b   :  { %s277_s27 = smov 128   ;;  %s278_s28 = smov 8  }
 0x21c   :  { %217 = dma.vmem_to_hbm [thread:$0]  %s212_s19, 256, %s332_s3, [#allocation4], %s277_s27, %s277_s27, %s278_s28  }
 0x21d   :  { %272 = dma.done.wait [#allocation4], 256  }
 0x21e   :  { %273 = vsyncadd [#allocation4], 4294967040 }
 0x21f   :  { %221 = vsyncpa [#allocation4], 1 }

</bundles_post_ra>
